<compile_context>
chip_gen: v7x
topology: tpu7x:2x2x1
jax: 0.10.0
libtpu: 0.0.40
codegen_flags: <defaults>
</compile_context>

<pallas_src>
import functools

import numpy as np
import jax
import jax.numpy as jnp
from jax import lax
from jax.experimental import pallas as pl
from jax.experimental.pallas import tpu as pltpu


# ---------------------------------------------------------------------------
# Kernel 1: spectral-norm power-iteration step -> (1/sigma, u_new) only
# ---------------------------------------------------------------------------
def _spectral_norm_kernel(w_ref, u_ref, isig_ref, unew_ref):
    # w_ref : (Cout, K)  flattened weight matrix, K = Cin*KH*KW
    # u_ref : (Cout, 1)
    w = w_ref[...].astype(jnp.float32)
    u = u_ref[...].astype(jnp.float32)

    # v = W^T u / ||W^T u||   (sublane reduce; rsqrt goes to the EUP slot)
    wtu = jnp.sum(w * u, axis=0, keepdims=True)                       # (1, K)
    v = wtu * lax.rsqrt(jnp.sum(wtu * wtu, axis=1, keepdims=True))    # (1, K)

    # W v, then u_new = W v / ||W v||   (lane reduce)
    wv = jnp.sum(w * v, axis=1, keepdims=True)                        # (Cout, 1)
    inv_norm = lax.rsqrt(jnp.sum(wv * wv, axis=0, keepdims=True))     # (1, 1)
    u_new = wv * inv_norm

    # sigma = u_new^T W v = ||W v||  =>  1/sigma = inv_norm
    isig_ref[...] = inv_norm.astype(isig_ref.dtype)
    unew_ref[...] = u_new.astype(unew_ref.dtype)


def spectral_norm_sigma(weight, u):
    """weight: (Cout, Cin, KH, KW), u: (Cout, 1) -> (inv_sigma (1,1) f32, u_new)."""
    cout = weight.shape[0]
    k = int(np.prod(weight.shape[1:]))
    w2d = weight.reshape(cout, k)
    inv_sigma, u_new = pl.pallas_call(
        _spectral_norm_kernel,
        out_shape=(jax.ShapeDtypeStruct((1, 1), jnp.float32),
                   jax.ShapeDtypeStruct((cout, 1), u.dtype)),
        grid_spec=pltpu.PrefetchScalarGridSpec(
            num_scalar_prefetch=0,
            grid=(1,),
            in_specs=[pl.BlockSpec((cout, k), lambda i: (0, 0)),
                      pl.BlockSpec((cout, 1), lambda i: (0, 0))],
            out_specs=[pl.BlockSpec((1, 1), lambda i: (0, 0)),
                       pl.BlockSpec((cout, 1), lambda i: (0, 0))],
        ),
        compiler_params=pltpu.CompilerParams(
            dimension_semantics=("arbitrary",)),
    )(w2d, u)
    return inv_sigma, u_new


# ---------------------------------------------------------------------------
# Kernel 2: conv2d with 1/sigma applied in-kernel (implicit GEMM, K = KW*Cin)
# ---------------------------------------------------------------------------
def _snconv2d_kernel(isig_ref, x_ref, w_ref, b_ref, o_ref, *, row_stride, l_blk):
    # isig_ref: (1, 1) f32 in SMEM                          1 / sigma
    # x_ref   : (1, 1, rows_in, KW*Cin) bf16  halo-padded, row-flattened image
    #           block with the kw column taps lane-concatenated: flat row
    #           p = y * row_stride + z is padded pixel (y, z) of this block.
    # w_ref   : (KH, KW*Cin, Cout_pad) bf16   original (un-normalized) weight
    # b_ref   : (1, Cout_pad) f32
    # o_ref   : (1, 1, l_blk, Cout_pad)       flat row q = r*row_stride + c;
    #           columns c >= W are junk and are dropped by the wrapper.
    kh = w_ref.shape[0]
    cout_pad = w_ref.shape[2]

    acc = jnp.zeros((l_blk, cout_pad), jnp.float32)
    for dh in range(kh):                      # static: KH bf16 dots, K = KW*Cin
        start = dh * row_stride
        xs = x_ref[0, 0, start:start + l_blk, :]           # (l_blk, KW*Cin) bf16
        acc = acc + jnp.dot(xs, w_ref[dh],                  # (KW*Cin, Cout_pad)
                            preferred_element_type=jnp.float32)

    # conv is linear in the weight: conv(x, W / sigma) = conv(x, W) * (1/sigma)
    acc = acc * isig_ref[0, 0] + b_ref[...].astype(jnp.float32)
    o_ref[0, 0] = acc.astype(o_ref.dtype)     # single dense, lane-full store


def _pick_row_block(h, target):
    rb = min(target, h)
    while h % rb:
        rb -= 1
    return rb


def snconv2d(x_nchw, weight, bias, inv_sigma, *, row_block=8):
    """y = conv2d(x, weight/sigma, bias): NCHW in/out, stride 1, 'same' pad."""
    n, cin, h, w = x_nchw.shape
    cout, _, kh, kw = weight.shape
    ph, pw = kh // 2, kw // 2
    # TODO(synk): stride != 1, dilation and groups of nn.Conv2d not implemented.

    wp = w + 2 * pw                     # padded row width (implicit-GEMM stride)
    hp = h + 2 * ph
    kwcin = kw * cin
    cout_pad = pl.cdiv(cout, 128) * 128          # lane-dense output channels
    rb = _pick_row_block(h, row_block)           # output image rows per step
    nrb = h // rb
    l_blk = rb * wp                              # flattened output rows / block
    rows_in = (rb + kh - 1) * wp                 # input rows / block (w/ halo)

    # --- wrapper-side layout plumbing (XLA fuses most of these passes) -------
    # TODO(synk): in an NHWC end-to-end model the two transposes disappear.
    x_nhwc = jnp.transpose(x_nchw, (0, 2, 3, 1))                   # (N,H,W,Cin)
    xp = jnp.pad(x_nhwc, ((0, 0), (ph, ph), (pw, pw), (0, 0)))     # (N,Hp,Wp,Cin)
    xflat = xp.reshape(n, hp * wp, cin)
    xflat = jnp.pad(xflat, ((0, 0), (0, kw - 1), (0, 0)))          # dw shift room
    # Lane-concat of the kw shifted views: contraction K folds Cin -> KW*Cin.
    xcat = jnp.concatenate(
        [xflat[:, dw:dw + hp * wp, :] for dw in range(kw)], axis=-1)
    xcat = xcat.astype(jnp.bfloat16)                               # cast once
    # Row blocks with duplicated halo rows so BlockSpecs stay non-overlapping.
    xcat_b = jnp.stack(
        [xcat[:, r * rb * wp:r * rb * wp + rows_in, :] for r in range(nrb)],
        axis=1)                                           # (N,NRB,rows_in,KW*Cin)

    # Original weight taps (KH, KW*Cin, Cout) padded to lane-dense Cout, bf16.
    w_taps = jnp.transpose(weight, (2, 3, 1, 0)).reshape(kh, kwcin, cout)
    w_taps = jnp.pad(w_taps, ((0, 0), (0, 0), (0, cout_pad - cout)))
    w_taps = w_taps.astype(jnp.bfloat16)
    b2 = jnp.pad(bias.reshape(1, cout), ((0, 0), (0, cout_pad - cout)))
    b2 = b2.astype(jnp.float32)

    out_rows = pl.pallas_call(
        functools.partial(_snconv2d_kernel, row_stride=wp, l_blk=l_blk),
        out_shape=jax.ShapeDtypeStruct((n, nrb, l_blk, cout_pad), x_nchw.dtype),
        grid_spec=pltpu.PrefetchScalarGridSpec(
            num_scalar_prefetch=0,
            grid=(n, nrb),
            in_specs=[
                pl.BlockSpec(memory_space=pltpu.MemorySpace.SMEM),  # 1/sigma
                pl.BlockSpec((1, 1, rows_in, kwcin),
                             lambda i, j: (i, j, 0, 0)),
                # Constant-index weight/bias blocks: Pallas revisit detection
                # keeps them resident (no re-DMA across grid steps).
                pl.BlockSpec((kh, kwcin, cout_pad), lambda i, j: (0, 0, 0)),
                pl.BlockSpec((1, cout_pad), lambda i, j: (0, 0)),
            ],
            out_specs=pl.BlockSpec((1, 1, l_blk, cout_pad),
                                   lambda i, j: (i, j, 0, 0)),
        ),
        compiler_params=pltpu.CompilerParams(
            dimension_semantics=("parallel", "parallel"),
            vmem_limit_bytes=32 * 1024 * 1024),
    )(inv_sigma, xcat_b, w_taps, b2)

    # Drop junk columns / padded channels, back to NCHW.
    out = out_rows.reshape(n, h, wp, cout_pad)[:, :, :w, :cout]
    return jnp.transpose(out, (0, 3, 1, 2))


def spectral_norm_conv2d_forward(x, weight, bias, u):
    """Forward of SpectralNormConv2d: returns (output, updated u)."""
    inv_sigma, u_new = spectral_norm_sigma(weight, u)
    return snconv2d(x, weight, bias, inv_sigma), u_new


# ---------------------------------------------------------------------------
# Pure-JAX reference (mirrors the PyTorch module exactly)
# ---------------------------------------------------------------------------
def reference_forward(x, weight, bias, u):
    cout = weight.shape[0]
    wm = weight.reshape(cout, -1)
    v = wm.T @ u
    v = v / jnp.linalg.norm(v)
    u_new = wm @ v
    u_new = u_new / jnp.linalg.norm(u_new)
    sigma = (u_new.T @ wm @ v)[0, 0]
    w_sn = (wm / sigma).reshape(weight.shape)
    out = lax.conv_general_dilated(
        x, w_sn, window_strides=(1, 1),
        padding=((weight.shape[2] // 2,) * 2, (weight.shape[3] // 2,) * 2),
        dimension_numbers=("NCHW", "OIHW", "NCHW"))
    return out + bias[None, :, None, None], u_new


if __name__ == "__main__":
    key = jax.random.PRNGKey(0)
    kx, kw_, ku = jax.random.split(key, 3)

    n, cin, h, w = 2, 4, 16, 16
    cout, ksz = 8, 3

    x = jax.random.normal(kx, (n, cin, h, w), dtype=jnp.float32)
    # kaiming_normal weight, zero bias, u = randn(Cout,1)*0.1  -- as in the module
    fan_in = cin * ksz * ksz
    weight = jax.random.normal(kw_, (cout, cin, ksz, ksz), jnp.float32) * \
        np.sqrt(2.0 / fan_in)
    bias = jnp.zeros((cout,), jnp.float32)
    u = 0.1 * jax.random.normal(ku, (cout, 1), jnp.float32)

    out, u_new = spectral_norm_conv2d_forward(x, weight, bias, u)
    out = jax.block_until_ready(out)
    u_new = jax.block_until_ready(u_new)

    with jax.default_matmul_precision("float32"):
        ref_out, ref_u = reference_forward(x, weight, bias, u)
        ref_out = jax.block_until_ready(ref_out)

    assert out.shape == ref_out.shape and out.dtype == ref_out.dtype
    err = float(np.max(np.abs(np.asarray(out) - np.asarray(ref_out))))
    # Tolerance covers bf16 MXU operands (f32 accumulation) vs. the full-f32
    # XLA reference convolution.
    assert np.allclose(np.asarray(out), np.asarray(ref_out),
                       atol=2e-2, rtol=2e-2), err
    assert np.allclose(np.asarray(u_new), np.asarray(ref_u),
                       atol=1e-4, rtol=1e-4)

    print("KERNEL_OK")
</pallas_src>

<mosaic_0001>
module attributes {stable_mosaic.version = 11 : i64} {
  func.func @_spectral_norm_kernel(%arg0: i32, %arg1: memref<8x36xf32, #tpu.memory_space<vmem>>, %arg2: memref<8x1xf32, #tpu.memory_space<vmem>>, %arg3: memref<1x1xf32, #tpu.memory_space<vmem>>, %arg4: memref<8x1xf32, #tpu.memory_space<vmem>>) attributes {dimension_semantics = [#tpu.dimension_semantics<arbitrary>], iteration_bounds = array<i64: 1>, scalar_prefetch = 0 : i64, scratch_operands = 0 : i64, tpu.core_type = #tpu.core_type<tc>, window_params = [{pipeline_mode = #tpu.pipeline_mode<synchronous>, transform_indices = @transform_0, window_bounds = array<i64: 8, 36>}, {pipeline_mode = #tpu.pipeline_mode<synchronous>, transform_indices = @transform_1, window_bounds = array<i64: 8, 1>}, {pipeline_mode = #tpu.pipeline_mode<synchronous>, transform_indices = @transform_2, window_bounds = array<i64: 1, 1>}, {pipeline_mode = #tpu.pipeline_mode<synchronous>, transform_indices = @transform_3, window_bounds = array<i64: 8, 1>}]} {
    %c0 = arith.constant 0 : index
    %c0_0 = arith.constant 0 : index
    %0 = vector.load %arg1[%c0, %c0_0] : memref<8x36xf32, #tpu.memory_space<vmem>>, vector<8x36xf32>
    %c0_1 = arith.constant 0 : index
    %c0_2 = arith.constant 0 : index
    %1 = vector.load %arg2[%c0_1, %c0_2] : memref<8x1xf32, #tpu.memory_space<vmem>>, vector<8x1xf32>
    %2 = vector.broadcast %1 : vector<8x1xf32> to vector<8x36xf32>
    %3 = arith.mulf %0, %2 : vector<8x36xf32>
    %cst = arith.constant dense<0.000000e+00> : vector<36xf32>
    %4 = vector.multi_reduction <add>, %3, %cst [0] : vector<8x36xf32> to vector<36xf32>
    %5 = vector.shape_cast %4 : vector<36xf32> to vector<1x36xf32>
    %6 = arith.mulf %5, %5 : vector<1x36xf32>
    %cst_3 = arith.constant dense<0.000000e+00> : vector<1xf32>
    %7 = vector.multi_reduction <add>, %6, %cst_3 [1] : vector<1x36xf32> to vector<1xf32>
    %8 = vector.shape_cast %7 : vector<1xf32> to vector<1x1xf32>
    %9 = math.rsqrt %8 : vector<1x1xf32>
    %10 = vector.broadcast %9 : vector<1x1xf32> to vector<1x36xf32>
    %11 = arith.mulf %5, %10 : vector<1x36xf32>
    %12 = vector.broadcast %11 : vector<1x36xf32> to vector<8x36xf32>
    %13 = arith.mulf %0, %12 : vector<8x36xf32>
    %cst_4 = arith.constant dense<0.000000e+00> : vector<8xf32>
    %14 = vector.multi_reduction <add>, %13, %cst_4 [1] : vector<8x36xf32> to vector<8xf32>
    %15 = vector.shape_cast %14 : vector<8xf32> to vector<8x1xf32>
    %16 = arith.mulf %15, %15 : vector<8x1xf32>
    %cst_5 = arith.constant dense<0.000000e+00> : vector<1xf32>
    %17 = vector.multi_reduction <add>, %16, %cst_5 [0] : vector<8x1xf32> to vector<1xf32>
    %18 = vector.shape_cast %17 : vector<1xf32> to vector<1x1xf32>
    %19 = math.rsqrt %18 : vector<1x1xf32>
    %20 = vector.broadcast %19 : vector<1x1xf32> to vector<8x1xf32>
    %21 = arith.mulf %15, %20 : vector<8x1xf32>
    %c0_6 = arith.constant 0 : index
    %c0_7 = arith.constant 0 : index
    %22 = vector.load %arg3[%c0_6, %c0_7] : memref<1x1xf32, #tpu.memory_space<vmem>>, vector<1x1xf32>
    tpu.vector_store %arg3[%c0_6, %c0_7], %19 {strides = array<i32>} : memref<1x1xf32, #tpu.memory_space<vmem>>, vector<1x1xf32>,
    %c0_8 = arith.constant 0 : index
    %c0_9 = arith.constant 0 : index
    %23 = vector.load %arg4[%c0_8, %c0_9] : memref<8x1xf32, #tpu.memory_space<vmem>>, vector<8x1xf32>
    tpu.vector_store %arg4[%c0_8, %c0_9], %21 {strides = array<i32>} : memref<8x1xf32, #tpu.memory_space<vmem>>, vector<8x1xf32>,
    return
  }
  func.func @transform_0(%arg0: i32) -> (i32, i32) {
    %c0_i32 = arith.constant 0 : i32
    %c0_i32_0 = arith.constant 0 : i32
    %c0_i32_1 = arith.constant 0 : i32
    return %c0_i32, %c0_i32_0 : i32, i32
  }
  func.func @transform_1(%arg0: i32) -> (i32, i32) {
    %c0_i32 = arith.constant 0 : i32
    %c0_i32_0 = arith.constant 0 : i32
    %c0_i32_1 = arith.constant 0 : i32
    return %c0_i32, %c0_i32_0 : i32, i32
  }
  func.func @transform_2(%arg0: i32) -> (i32, i32) {
    %c0_i32 = arith.constant 0 : i32
    %c0_i32_0 = arith.constant 0 : i32
    %c0_i32_1 = arith.constant 0 : i32
    return %c0_i32, %c0_i32_0 : i32, i32
  }
  func.func @transform_3(%arg0: i32) -> (i32, i32) {
    %c0_i32 = arith.constant 0 : i32
    %c0_i32_0 = arith.constant 0 : i32
    %c0_i32_1 = arith.constant 0 : i32
    return %c0_i32, %c0_i32_0 : i32, i32
  }
}

</mosaic_0001>

<bundles_post_ra>
// kernel: tpu_custom_call.1
= control target key start
LH: loop header
LB: loop body
LE: loop exit
PB: predicated region body
PF: predicated region fallthrough
CT: control target
= control target key end

     0   :  { %s149_s0 = inlined_call_operand.vmem [shape: f32[8,36], index: 0, kind: input, shape index: {}]   ;;  %s150_s1 = inlined_call_operand.vmem [shape: f32[8,1], index: 1, kind: input, shape index: {}]   ;;  %s151_s2 = inlined_call_operand.hbm [shape: f32[1,1], index: 2, kind: output, shape index: {0}]   ;;  %s152_s3 = inlined_call_operand.vmem [shape: f32[8,1], index: 3, kind: output, shape index: {1}]  }
   0x1   :  { %v15_v0 = vld [vmem:[%s150_s1] sm:$0xff] }
   0x2   :  { %9 = vsyncpa [#allocation3], 0  ;;  %v102_v1 = vmov 0   ;;  %v14_v2 = vld [vmem:[%s149_s0] sm:$0xff]  ;;  %vm22_vm0 = vcmask 293888   ;;  %s103_s0 = smov [#allocation2]  }
   0x3   :  { %73 = vset.pattern.permute.xlu0 %v102_v1  ;;  %s59_s1 = sshll.u32 %s103_s0, 4  ;;  %vm49_vm1 = vcmask 0   ;;  %vm51_vm2 = vcmask 7168   ;;  %s60_s1 = int_to_ptr.vmem [resolvable:$true] %s59_s1 }
   0x4   :  { %18 = vperm.xlu0 %73, %v15_v0   ;;  %s78_s16 = scalar_lea.vmem %s60_s1, 16  ;;  %s82_s17 = scalar_lea.vmem %s60_s1, 32 }
   0x5   :  { %p79_p0 = scmp.ne.s32.totalorder %s60_s1, %s78_s16  ;;  %p83_p1 = scmp.lt.s32.totalorder %s60_s1, %s60_s1 }
   0x6   :  { %p84_p2 = scmp.lt.s32.totalorder %s82_s17, %s78_s16 }
   0x8   :  { %p85_p3 = por %p84_p2, %p83_p1 }
   0xa   :  { %p86_p4 = pnand %p85_p3, %p79_p0 }
  0x83   :  { %v19_v3 = vpop.permute.xlu0 %18 }
  0x84   :  { %v21_v4 = vmul.f32 %v19_v3, %v14_v2 }
  0x86   :  { %v23_v5 = vsel %vm22_vm0, %v21_v4, 0.0 }
  0x87   :  { %v24_v6 = vrot.slane %v23_v5, 4 }
  0x89   :  { %v25_v7 = vadd.f32 %v24_v6, %v23_v5 }
  0x8b   :  { %v26_v8 = vrot.slane %v25_v7, 2 }
  0x8d   :  { %v27_v9 = vadd.f32 %v26_v8, %v25_v7 }
  0x8f   :  { %v28_v10 = vrot.slane %v27_v9, 1 }
  0x91   :  { %v29_v11 = vadd.f32 %v28_v10, %v27_v9 }
  0x93   :  { %v30_v12 = vmul.f32 %v29_v11, %v29_v11 }
  0x95   :  { %v31_v13 = vsel %vm22_vm0, %v30_v12, 0.0 }
  0x96   :  { %32 = vadd.xlane.f32.xlu0 %v31_v13 }
 0x123   :  { %v33_v14 = vpop.xlane.xlu0 %32 }
 0x124   :  { %74 = vrsqrt.f32 %v33_v14 }
 0x12e   :  { %v75_v15 = vpop.eup %74 }
 0x12f   :  { %v35_v16 = vmul.f32 %v75_v15, %v29_v11 }
 0x131   :  { %v36_v17 = vmul.f32 %v35_v16, %v14_v2 }
 0x133   :  { %v37_v18 = vsel %vm22_vm0, %v36_v17, 0.0 }
 0x134   :  { %38 = vadd.xlane.f32.xlu1 %v37_v18 }
 0x1c1   :  { %v39_v19 = vpop.xlane.xlu1 %38 }
 0x1c2   :  { %v40_v20 = vmul.f32 %v39_v19, %v39_v19 }
 0x1c4   :  { %v41_v21 = vrot.slane %v40_v20, 4 }
 0x1c6   :  { %v42_v22 = vadd.f32 %v41_v21, %v40_v20 }
 0x1c8   :  { %v43_v23 = vrot.slane %v42_v22, 2 }
 0x1ca   :  { %v44_v24 = vadd.f32 %v43_v23, %v42_v22 }
 0x1cc   :  { %v45_v25 = vrot.slane %v44_v24, 1 }
 0x1ce   :  { %v46_v26 = vadd.f32 %v45_v25, %v44_v24 }
 0x1d0   :  { %76 = vrsqrt.f32 %v46_v26 }
 0x1da   :  { %v77_v27 = vpop.eup %76 }
 0x1db   :  { %v48_v28 = vmul.f32 %v77_v27, %v39_v19  ;;  %50 = vst.msk [vmem:[#allocation2] sm:$0x1] %vm49_vm1, %v77_v27 }
 0x1dc   :  { %89 = shalt.err (!%p86_p4)
}
 0x1dd   :  { %s90_s20 = scalar_lea.hbm %s151_s2, 16 }
 0x1de   :  { %p91_p5 = scmp.ne.s32.totalorder %s151_s2, %s90_s20  ;;  %p94_p6 = scmp.lt.u32.totalorder %s90_s20, %s151_s2 }
 0x1e0   :  { %p96_p7 = pnand %p94_p6, %p91_p5 }
 0x1e2   :  { %99 = shalt.err (!%p96_p7)
}
 0x1e3   :  { %62 = dma.vmem_to_hbm [thread:$0]  %s60_s1, 16, %s151_s2, [#allocation3]   ;;  %52 = vst.msk [vmem:[%s152_s3] sm:$0xff] %vm51_vm2, %v48_v28 }
 0x1e4   :  { %100 = dma.done.wait [#allocation3], 16  }
 0x1e5   :  { %101 = vsyncadd [#allocation3], 4294967280 }
 0x1e6   :  { %70 = vsyncpa [#allocation3], 1 }

</bundles_post_ra>
